<compile_context>
chip_gen: v7x
topology: tpu7x:2x2x1
jax: 0.10.0
libtpu: 0.0.40
codegen_flags: <defaults>
</compile_context>

<pallas_src>
import math
import jax
import jax.numpy as jnp
from jax.experimental import pallas as pl
from jax.experimental.pallas import tpu as pltpu


def _mci_kernel(x_ref, w_ref, b_ref, o_ref):
    # x_ref : (C_in, T_HW)   hidden tile (HW on lanes)
    # w_ref : (C_out, C_in)  per-batch modulated 1x1 conv weight
    # b_ref : (C_out, 1)     output bias
    # o_ref : (C_out, T_HW)
    y = jnp.dot(w_ref[...], x_ref[...], preferred_element_type=jnp.float32)
    o_ref[...] = (y + b_ref[...]).astype(o_ref.dtype)


def _pick_hw_tile(hw, c_in, c_out, itemsize=4, budget_bytes=12 * 1024 * 1024):
    """Largest multiple-of-128 divisor of HW whose double-buffered in+out blocks fit
    a conservative VMEM budget (safe for v7x's 64 MiB VMEM / 32 MiB scoped default)."""
    if hw % 128 != 0:
        return hw  # full-extent block (allowed regardless of (8,128) divisibility)
    t = hw
    per_lane = 2 * (c_in + c_out) * itemsize  # double-buffered input + output bytes / lane
    while t * per_lane > budget_bytes and t % 256 == 0:
        t //= 2
    return t


def multichannel_image(hidden_nchw, style, conv_weight, mod_weight, mod_bias, out_bias):
    """
    hidden_nchw : (B, C_in, H, W)  float32
    style       : (B, S)           float32
    conv_weight : (C_out, C_in, 1, 1)
    mod_weight  : (C_in, S)        (torch Linear weight layout)
    mod_bias    : (C_in,)
    out_bias    : (1, C_out, 1, 1)
    returns     : (B, C_out, H, W)
    """
    B, C_in, H, W = hidden_nchw.shape
    C_out = conv_weight.shape[0]
    HW = H * W
    k = conv_weight.shape[2]
    scale = 1.0 / math.sqrt(C_in * k * k)

    # --- tiny glue in plain JAX (O(B*C_in*C_out), negligible vs the image tensor) ---
    # mod[b, c] = scale * (style[b] @ mod_weight.T + mod_bias)[c]
    mod = scale * (style @ mod_weight.T + mod_bias)                    # (B, C_in)
    w2d = conv_weight.reshape(C_out, C_in)                             # (C_out, C_in)
    w_fold = mod[:, None, :] * w2d[None, :, :]                         # (B, C_out, C_in)
    bias2d = out_bias.reshape(C_out, 1).astype(jnp.float32)            # (C_out, 1)

    # NCHW -> (B, C_in, HW) is a free view reshape (no transpose).
    x = hidden_nchw.reshape(B, C_in, HW)

    t_hw = _pick_hw_tile(HW, C_in, C_out)
    assert HW % t_hw == 0
    n_hw_tiles = HW // t_hw

    out = pl.pallas_call(
        _mci_kernel,
        out_shape=jax.ShapeDtypeStruct((B, C_out, HW), hidden_nchw.dtype),
        grid_spec=pltpu.PrefetchScalarGridSpec(
            num_scalar_prefetch=0,
            grid=(B, n_hw_tiles),
            in_specs=[
                pl.BlockSpec((None, C_in, t_hw), lambda b, t: (b, 0, t)),
                pl.BlockSpec((None, C_out, C_in), lambda b, t: (b, 0, 0)),
                pl.BlockSpec((C_out, 1), lambda b, t: (0, 0)),
            ],
            out_specs=pl.BlockSpec((None, C_out, t_hw), lambda b, t: (b, 0, t)),
        ),
        compiler_params=pltpu.CompilerParams(
            dimension_semantics=("parallel", "parallel"),
            vmem_limit_bytes=64 * 1024 * 1024,
        ),
    )(x, w_fold, bias2d)

    return out.reshape(B, C_out, H, W)


def _reference(hidden_nchw, style, conv_weight, mod_weight, mod_bias, out_bias):
    # Pure-JAX reference replicating the PyTorch module exactly.
    B, C_in, H, W = hidden_nchw.shape
    C_out = conv_weight.shape[0]
    k = conv_weight.shape[2]
    scale = 1.0 / math.sqrt(C_in * k * k)
    mod = scale * (style @ mod_weight.T + mod_bias)           # (B, C_in)
    x = mod[:, :, None, None] * hidden_nchw                   # (B, C_in, H, W)
    w = conv_weight.reshape(C_out, C_in)                      # 1x1 conv
    y = jnp.einsum('oc,bchw->bohw', w, x)
    return y + out_bias


if __name__ == "__main__":
    B, C_in, C_out, S, Hs, Ws = 2, 4, 8, 32, 16, 16

    key = jax.random.PRNGKey(0)
    k1, k2, k3, k4 = jax.random.split(key, 4)

    hidden = jax.random.normal(k1, (B, C_in, Hs, Ws), dtype=jnp.float32)
    style = jax.random.normal(k2, (B, S), dtype=jnp.float32)

    # Parameters (deterministic init mimicking the module's __init__):
    conv_weight = jax.random.normal(k3, (C_out, C_in, 1, 1), dtype=jnp.float32)   # torch.randn
    mod_weight = jax.random.normal(k4, (C_in, S), dtype=jnp.float32) * (1.0 / math.sqrt(S))
    mod_bias = jnp.ones((C_in,), dtype=jnp.float32)            # modulation.bias.data.fill_(1.0)
    out_bias = jnp.zeros((1, C_out, 1, 1), dtype=jnp.float32)  # torch.zeros

    out = multichannel_image(hidden, style, conv_weight, mod_weight, mod_bias, out_bias)
    out = jax.block_until_ready(out)

    ref = _reference(hidden, style, conv_weight, mod_weight, mod_bias, out_bias)
    assert out.shape == (B, C_out, Hs, Ws)
    assert jnp.allclose(out, ref, atol=1e-4, rtol=1e-4), "mismatch vs reference"

    print("KERNEL_OK")
</pallas_src>

<mosaic_0001>
module attributes {stable_mosaic.version = 11 : i64} {
  func.func @_mci_kernel(%arg0: i32, %arg1: i32, %arg2: memref<1x4x256xf32, #tpu.memory_space<vmem>>, %arg3: memref<1x8x4xf32, #tpu.memory_space<vmem>>, %arg4: memref<8x1xf32, #tpu.memory_space<vmem>>, %arg5: memref<1x8x256xf32, #tpu.memory_space<vmem>>) attributes {dimension_semantics = [#tpu.dimension_semantics<parallel>, #tpu.dimension_semantics<parallel>], iteration_bounds = array<i64: 2, 1>, scalar_prefetch = 0 : i64, scratch_operands = 0 : i64, tpu.core_type = #tpu.core_type<tc>, window_params = [{transform_indices = @transform_0, window_bounds = array<i64: 1, 4, 256>}, {transform_indices = @transform_1, window_bounds = array<i64: 1, 8, 4>}, {pipeline_mode = #tpu.pipeline_mode<synchronous>, transform_indices = @transform_2, window_bounds = array<i64: 8, 1>}, {transform_indices = @transform_3, window_bounds = array<i64: 1, 8, 256>}]} {
    %c0 = arith.constant 0 : index
    %c0_0 = arith.constant 0 : index
    %c0_1 = arith.constant 0 : index
    %0 = vector.load %arg3[%c0, %c0_0, %c0_1] : memref<1x8x4xf32, #tpu.memory_space<vmem>>, vector<1x8x4xf32>
    %1 = vector.shape_cast %0 : vector<1x8x4xf32> to vector<8x4xf32>
    %c0_2 = arith.constant 0 : index
    %c0_3 = arith.constant 0 : index
    %c0_4 = arith.constant 0 : index
    %2 = vector.load %arg2[%c0_2, %c0_3, %c0_4] : memref<1x4x256xf32, #tpu.memory_space<vmem>>, vector<1x4x256xf32>
    %3 = vector.shape_cast %2 : vector<1x4x256xf32> to vector<4x256xf32>
    %cst = arith.constant dense<0.000000e+00> : vector<8x256xf32>
    %4 = tpu.matmul %1, %3, %cst {dimension_numbers = #tpu.dot_dimension_numbers<[1], [0], [0], [1], [0, 0, 1, 1], [], []>} : vector<8x4xf32>, vector<4x256xf32>, vector<8x256xf32> -> vector<8x256xf32>
    %c0_5 = arith.constant 0 : index
    %c0_6 = arith.constant 0 : index
    %5 = vector.load %arg4[%c0_5, %c0_6] : memref<8x1xf32, #tpu.memory_space<vmem>>, vector<8x1xf32>
    %6 = vector.broadcast %5 : vector<8x1xf32> to vector<8x256xf32>
    %7 = arith.addf %4, %6 : vector<8x256xf32>
    %c0_7 = arith.constant 0 : index
    %c0_8 = arith.constant 0 : index
    %c0_9 = arith.constant 0 : index
    %8 = vector.load %arg5[%c0_7, %c0_8, %c0_9] : memref<1x8x256xf32, #tpu.memory_space<vmem>>, vector<1x8x256xf32>
    %9 = vector.shape_cast %8 : vector<1x8x256xf32> to vector<8x256xf32>
    %10 = vector.shape_cast %7 : vector<8x256xf32> to vector<1x8x256xf32>
    tpu.vector_store %arg5[%c0_7, %c0_8, %c0_9], %10 {strides = array<i32>} : memref<1x8x256xf32, #tpu.memory_space<vmem>>, vector<1x8x256xf32>,
    return
  }
  func.func @transform_0(%arg0: i32, %arg1: i32) -> (i32, i32, i32) {
    %c0_i32 = arith.constant 0 : i32
    %c0_i32_0 = arith.constant 0 : i32
    return %arg0, %c0_i32, %arg1 : i32, i32, i32
  }
  func.func @transform_1(%arg0: i32, %arg1: i32) -> (i32, i32, i32) {
    %c0_i32 = arith.constant 0 : i32
    %c0_i32_0 = arith.constant 0 : i32
    %c0_i32_1 = arith.constant 0 : i32
    return %arg0, %c0_i32, %c0_i32_0 : i32, i32, i32
  }
  func.func @transform_2(%arg0: i32, %arg1: i32) -> (i32, i32) {
    %c0_i32 = arith.constant 0 : i32
    %c0_i32_0 = arith.constant 0 : i32
    %c0_i32_1 = arith.constant 0 : i32
    return %c0_i32, %c0_i32_0 : i32, i32
  }
  func.func @transform_3(%arg0: i32, %arg1: i32) -> (i32, i32, i32) {
    %c0_i32 = arith.constant 0 : i32
    %c0_i32_0 = arith.constant 0 : i32
    return %arg0, %c0_i32, %arg1 : i32, i32, i32
  }
}

</mosaic_0001>

<bundles_post_ra>
// kernel: tpu_custom_call.1
= control target key start
LH: loop header
LB: loop body
LE: loop exit
PB: predicated region body
PF: predicated region fallthrough
CT: control target
= control target key end

     0   :  { %s1043_s0 = inlined_call_operand.hbm [shape: f32[2,4,256], index: 0, kind: input, shape index: {}]   ;;  %s1044_s1 = inlined_call_operand.hbm [shape: f32[2,8,4], index: 1, kind: input, shape index: {}]   ;;  %s1045_s2 = inlined_call_operand.hbm [shape: f32[8,1], index: 2, kind: input, shape index: {}]   ;;  %s1046_s3 = inlined_call_operand.hbm [shape: f32[2,8,256], index: 3, kind: output, shape index: {}]  }
   0x1   :  { %1052 = sst [smem:[#allocation14_spill]] %s1045_s2 }
   0x2   :  { %8 = vsyncpa [#allocation3], 0 }
   0x3   :  { %10 = vsyncpa [#allocation3 + $0x1], 0 }
   0x4   :  { %11 = vsyncpa [#allocation6], 0 }
   0x5   :  { %13 = vsyncpa [#allocation6 + $0x1], 0 }
   0x6   :  { %14 = vsyncpa [#allocation4], 0 }
   0x7   :  { %16 = vsyncpa [#allocation4 + $0x1], 0  ;;  %s794_s12 = smov 0   ;;  %s796_s13 = smov 0  }
   0x8   :  { %s798_s14 = smov 0   ;;  %s800_s15 = smov 0  }
   0x9   :  { %s802_s16 = smov 0   ;;  %s804_s17 = smov 0  }
   0xa LB: > { %s825_s18 = sadd.s32 4294967295, %s766_s17   ;;  %s482_s19 = sadd.s32 4294967294, %s766_s17   ;;  %s766_s17 = sphi %s804_s17, %s22_s17   ;;  %s762_s16 = sphi %s802_s16, %s1076_s16   ;;  %s758_s15 = sphi %s800_s15, %s1075_s15   ;;  %s754_s14 = sphi %s798_s14, %s1074_s14   ;;  %s750_s13 = sphi %s796_s13, %s1073_s13   ;;  %s746_s12 = sphi %s794_s12, %s1072_s12  }
   0xb   : > { %p56_p0 = scmp.ne.s32.totalorder %s750_s13, %s746_s12  ;;  %p1047_p1 = scmp.eq.s32.totalorder %s825_s18, 0 }
   0xc   : > { %p135_p3 = scmp.eq.s32.totalorder %s482_s19, 1  ;;  %p483_p5 = scmp.ge.s32.totalorder %s766_s17, 1 }
   0xd   : > { %p834_p4 = por %p1047_p1, %p56_p0  ;;  %p142_p7 = scmp.lt.s32.totalorder %s766_s17, 3 }
   0xe   : > { %p839_p6 = por %p135_p3, %p56_p0  ;;  %s768_s23 = smov [#allocation7]  }
   0xf   : > { %s1053_s20 = scalar_select %p834_p4, 1, 0 }
  0x10   : > { %s1054_s21 = scalar_select %p839_p6, 1, 0 }
  0x11   : > { %p844_p8 = pnand %p483_p5, %p142_p7  ;;  %s155_s24 = sshll.u32 %s768_s23, 4  ;;  %s156_s24 = int_to_ptr.vmem [resolvable:$true] %s155_s24 }
  0x12   : > { %s34_s26 = sadd.s32 1, %s762_s16  ;;  %s43_s27 = sadd.s32 1, %s754_s14 }
  0x13   : > { %s1055_s22 = scalar_select %p844_p8, 1, 0 }
  0x14   : > { %p516_p10 = pneg %p844_p8  ;;  %p859_p12 = scmp.ge.s32.totalorder %s34_s26, 2 }
  0x15   : > { %s1058_s2 = sld [smem:[#allocation14_spill]] }
  0x16   : > { %p853_p11 = pnand %p516_p10, %p1047_p1 }
  0x17   : > { %s1057_s28 = scalar_select %p859_p12, 1, 0 }
  0x18   : > { %p590_p0 = pneg %p853_p11 }
  0x1b   : > { %s588_s4 = scalar_lea.hbm %s1058_s2, 128 }
  0x1c   : > { %p589_p13 = scmp.ne.s32.totalorder %s1058_s2, %s588_s4  ;;  %p595_p7 = scmp.lt.u32.totalorder %s588_s4, %s1058_s2 }
  0x1e   : > { %p591_p3 = pnand %p590_p0, %p589_p13 }
  0x20   : > { %p592_p5 = pneg %p591_p3 }
  0x22   : > { %p597_p10 = pnand %p595_p7, %p592_p5 }
  0x24   : > { %600 = shalt.err (!%p597_p10)
}
  0x25   : > { %s601_s9 = scalar_lea.vmem %s156_s24, 128  ;;  %p609_p6 = scmp.lt.s32.totalorder %s156_s24, %s156_s24 }
  0x26   : > { %p602_p9 = scmp.ne.s32.totalorder %s156_s24, %s601_s9  ;;  %p610_p4 = scmp.lt.s32.totalorder %s601_s9, %s601_s9 }
  0x28   : > { %p604_p1 = pnand %p602_p9, %p590_p0  ;;  %p611_p8 = por %p610_p4, %p609_p6 }
  0x2a   : > { %p605_p2 = pneg %p604_p1 }
  0x2c   : > { %p612_p12 = pnand %p611_p8, %p605_p2 }
  0x2e   : > { %615 = shalt.err (!%p612_p12)
}
  0x2f   : > { %519 = dma.hbm_to_vmem [thread:$0]  (!%p853_p11), %s1058_s2, 128, %s156_s24, [#allocation6]  }
  0x30   : > { %p1059_p1 = scmp.ne.s32.totalorder %s1057_s28, 0  ;;  %p50_p2 = scmp.ne.s32.totalorder %s754_s14, %s750_s13 }
  0x31   : > { %p51_p4 = scmp.eq.s32.totalorder %s766_s17, 0  ;;  %p532_p6 = scmp.lt.s32.totalorder %s766_s17, 2 }
  0x32   : > { %s1078_s26 = smov (%p1059_p1, %s34_s26), 0  ;;  %p1061_p12 = scmp.eq.s32.totalorder %s825_s18, 1 }
  0x33   : > { %1060 = sst [smem:[#allocation13_spill]] %s1078_s26  ;;  %s38_s19 = ssub.s32 %s762_s16, %s1078_s26 }
  0x34   : > { %p41_p8 = scmp.eq.s32.totalorder %s38_s19, 0  ;;  %p52_p9 = por %p51_p4, %p50_p2 }
  0x35   : > { %p891_p13 = por %p1061_p12, %p50_p2  ;;  %s166_s25 = sand.u32 1, %s754_s14  }
  0x36   : > { %s899_s29 = scalar_select %p41_p8, %s754_s14, %s43_s27  }
  0x37   : > { %s1062_s23 = scalar_select %p891_p13, 1, 0 }
  0x38   : > { %s901_s24 = sshll.u32 %s166_s25, 3  ;;  %s504_s28 = sshll.u32 %s762_s16, 7 }
  0x39   : > { %s907_s5 = scalar_lea.hbm %s1043_s0, %s504_s28  ;;  %s170_s6 = scalar_lea.vmem [#allocation2], %s901_s24 }
  0x3a   : > { %s180_s7 = sshll.u32 %s170_s6, 4  ;;  %p912_p11 = pnand %p532_p6, %p52_p9  ;;  %s910_s7 = int_to_ptr.vmem [resolvable:$true] %s180_s7 }
  0x3b   : > { %s919_s10 = scalar_lea.hbm %s1044_s1, %s504_s28  ;;  %s187_s11 = sand.u32 1, %s766_s17  }
  0x3c   : > { %s167_s19 = scalar_lea.sflag [#allocation3], %s166_s25  ;;  %s616_s30 = scalar_lea.hbm %s907_s5, 128 }
  0x3d   : > { %p617_p0 = scmp.ne.s32.totalorder %s907_s5, %s616_s30  ;;  %p618_p3 = pneg %p912_p11 }
  0x3e   : > { %s621_s2 = scalar_lea.hbm %s1043_s0, 256  ;;  %p622_p10 = scmp.lt.u32.totalorder %s907_s5, %s1043_s0 }
  0x3f   : > { %p619_p5 = pnand %p618_p3, %p617_p0  ;;  %p623_p1 = scmp.lt.u32.totalorder %s621_s2, %s616_s30 }
  0x40   : > { %p625_p4 = scmp.lt.u32.totalorder %s616_s30, %s907_s5 }
  0x41   : > { %p620_p7 = pneg %p619_p5  ;;  %p624_p2 = por %p623_p1, %p622_p10 }
  0x43   : > { %p626_p6 = por %p625_p4, %p624_p2 }
  0x45   : > { %p627_p8 = pnand %p626_p6, %p620_p7 }
  0x47   : > { %630 = shalt.err (!%p627_p8)
}
  0x48   : > { %s631_s25 = scalar_lea.vmem %s910_s7, 128  ;;  %s769_s28 = smov [#allocation2]  }
  0x49   : > { %p632_p9 = scmp.ne.s32.totalorder %s910_s7, %s631_s25  ;;  %s636_s9 = sshll.u32 %s769_s28, 4  ;;  %s637_s9 = int_to_ptr.vmem [resolvable:$false] %s636_s9 }
  0x4a   : > { %s638_s26 = scalar_lea.vmem %s637_s9, 256  ;;  %p639_p5 = scmp.lt.s32.totalorder %s910_s7, %s637_s9 }
  0x4b   : > { %p634_p12 = pnand %p632_p9, %p618_p3  ;;  %p640_p10 = scmp.lt.s32.totalorder %s638_s26, %s631_s25 }
  0x4d   : > { %p635_p0 = pneg %p634_p12  ;;  %p641_p1 = por %p640_p10, %p639_p5 }
  0x4f   : > { %p642_p2 = pnand %p641_p1, %p635_p0 }
  0x51   : > { %645 = shalt.err (!%p642_p2)
}
  0x52   : > { %523 = dma.hbm_to_vmem [thread:$0]  (!%p912_p11), %s907_s5, 128, %s910_s7, %s167_s19  }
  0x53   : > { %s191_s2 = scalar_lea.vmem [#allocation5], %s901_s24  ;;  %s188_s4 = scalar_lea.sflag [#allocation6], %s187_s11 }
  0x54   : > { %s198_s30 = sshll.u32 %s191_s2, 4  ;;  %s646_s6 = scalar_lea.hbm %s919_s10, 128  ;;  %s199_s30 = int_to_ptr.vmem [resolvable:$true] %s198_s30 }
  0x55   : > { %p647_p7 = scmp.ne.s32.totalorder %s919_s10, %s646_s6  ;;  %s651_s28 = scalar_lea.hbm %s1044_s1, 256 }
  0x56   : > { %p652_p8 = scmp.lt.u32.totalorder %s919_s10, %s1044_s1  ;;  %p653_p9 = scmp.lt.u32.totalorder %s651_s28, %s646_s6 }
  0x57   : > { %p649_p4 = pnand %p647_p7, %p618_p3  ;;  %p655_p0 = scmp.lt.u32.totalorder %s646_s6, %s919_s10 }
  0x58   : > { %p654_p12 = por %p653_p9, %p652_p8 }
  0x59   : > { %p650_p6 = pneg %p649_p4 }
  0x5a   : > { %p656_p5 = por %p655_p0, %p654_p12 }
  0x5c   : > { %p657_p10 = pnand %p656_p5, %p650_p6 }
  0x5e   : > { %660 = shalt.err (!%p657_p10)
}
  0x5f   : > { %s661_s24 = scalar_lea.vmem %s199_s30, 128  ;;  %s770_s5 = smov [#allocation5]  }
  0x60   : > { %p662_p1 = scmp.ne.s32.totalorder %s199_s30, %s661_s24  ;;  %s666_s7 = sshll.u32 %s770_s5, 4  ;;  %s667_s7 = int_to_ptr.vmem [resolvable:$false] %s666_s7 }
  0x61   : > { %s668_s11 = scalar_lea.vmem %s667_s7, 256  ;;  %p669_p4 = scmp.lt.s32.totalorder %s199_s30, %s667_s7 }
  0x62   : > { %p664_p2 = pnand %p662_p1, %p618_p3  ;;  %p670_p13 = scmp.lt.s32.totalorder %s668_s11, %s661_s24 }
  0x64   : > { %p665_p7 = pneg %p664_p2  ;;  %p671_p8 = por %p670_p13, %p669_p4 }
  0x66   : > { %p672_p9 = pnand %p671_p8, %p665_p7 }
  0x68   : > { %675 = shalt.err (!%p672_p9)
}
  0x69   : > { %526 = dma.hbm_to_vmem [thread:$0]  (!%p912_p11), %s919_s10, 128, %s199_s30, %s188_s4  }
  0x6a   : > { %p1064_p6 = scmp.ne.s32.totalorder %s1055_s22, 0 }
  0x6b   : > { %s972_s19 = sand.u32 (!%p1064_p6), 1, %s750_s13   ;;  %p1065_p3 = scmp.ne.s32.totalorder (!%p1064_p6), %s1053_s20, 0 }
  0x6c   : > { %207 = sbr.rel (%p1064_p6) target bundleno = 356 (0x164), region = 32  ;;  %s492_s2 = sshll.u32 (!%p1064_p6), %s972_s19, 3 }
  0x6d   : > { %s210_s6 = scalar_lea.sflag (!%p1064_p6), [#allocation3], %s972_s19  ;;  %s213_s8 = scalar_lea.vmem (!%p1064_p6), [#allocation2], %s492_s2 }
  0x73   : > { %729 = dma.done.wait (%p1065_p3), %s210_s6, 128  }
  0x74   : > { %731 = vsyncadd (%p1065_p3), %s210_s6, 4294967168  ;;  %s218_s27 = sand.u32 1, %s825_s18   ;;  %s222_s22 = scalar_lea.vmem [#allocation5], %s492_s2 }
  0x75   : > { %s219_s10 = scalar_lea.sflag [#allocation6], %s218_s27 }
  0x76   : > { %733 = dma.done.wait (%p1065_p3), %s219_s10, 128  }
  0x77   : > { %735 = vsyncadd (%p1065_p3), %s219_s10, 4294967168  ;;  %p1066_p13 = scmp.eq.s32.totalorder %s825_s18, 0 }
  0x79   : > { %737 = dma.done.wait (%p1066_p13), [#allocation6], 128   ;;  %p1067_p11 = pmov %p1066_p13 }
  0x7a   : > { %v771_v0 = vmov 0.0   ;;  %v772_v1 = vmov 0   ;;  %v257_v2 = vld [vmem:[%s213_s8] sm:$0xff]  ;;  %vm270_vm0 = vcmask 1043456   ;;  %v256_v5 = vld [vmem:[%s222_s22] sm:$0xff]  ;;  %vm266_vm1 = vcmask 31744  }
  0x7b   : > { %739 = vsyncadd (%p1067_p11), [#allocation6], 4294967168  ;;  %339 = vmatprep.mubr.f32.mxu0 %v771_v0  ;;  %586 = vset.pattern.permute.xlu0 %v772_v1  ;;  %v258_v3 = vld [vmem:[#allocation7] sm:$0xff]  ;;  %v265_v4 = vcombine.high %v257_v2, %v257_v2  ;;  %s495_s20 = sshll.u32 %s972_s19, 4  ;;  %s505_s18 = sshll.u32 %s758_s15, 8 }
  0x7c   : > { %261 = vperm.xlu0 %586, %v258_v3   ;;  %s253_s30 = scalar_lea.vmem [#allocation8], %s495_s20  ;;  %s994_s9 = scalar_lea.hbm %s1046_s3, %s505_s18 }
  0x7d   : > { %496 = vmatprep.subr.msk.mxu0 %vm270_vm0, %v265_v4  ;;  %s365_s4 = sshll.u32 %s253_s30, 4  ;;  %s349_s26 = scalar_lea.sflag [#allocation4], %s972_s19  ;;  %s996_s4 = int_to_ptr.vmem [resolvable:$true] %s365_s4 }
  0x7e   : > { %497 = vmatpush1.msk.msra.mxu0 %vm270_vm0, %v257_v2  ;;  %s676_s15 = scalar_lea.vmem %s996_s4, 256  ;;  %p1068_p0 = scmp.ne.s32.totalorder %s1062_s23, 0 }
  0x7f   : > { %498 = vmatmul.mubr.msk.f32.vlgmr.msra.gmra.mrb[0].mxu0 %vm266_vm1, %v256_v5  ;;  %p677_p12 = scmp.ne.s32.totalorder %s996_s4, %s676_s15  ;;  %s773_s24 = smov [#allocation8]  }
  0x80   : > { %s680_s5 = sshll.u32 %s773_s24, 4  ;;  %s681_s5 = int_to_ptr.vmem [resolvable:$false] %s680_s5 }
  0x81   : > { %p678_p5 = pnand %p677_p12, %p1068_p0  ;;  %s682_s7 = scalar_lea.vmem %s681_s5, 512 }
  0x82   : > { %p683_p1 = scmp.lt.s32.totalorder %s996_s4, %s681_s5  ;;  %p684_p2 = scmp.lt.s32.totalorder %s682_s7, %s676_s15 }
  0x83   : > { %p679_p10 = pneg %p678_p5 }
  0x84   : > { %p685_p7 = por %p684_p2, %p683_p1 }
  0x86   : > { %p686_p4 = pnand %p685_p7, %p679_p10 }
  0xfb   : > { %v262_v6 = vpop.permute.xlu0 %261 }
 0x152   : > { %v341_v7 = vpop.f32.mrb[0].mxu0 }
 0x153   : > { %v342_v8 = vadd.f32 %v341_v7, %v262_v6  ;;  %v343_v9 = vpop.f32.mrb[1].mxu0 }
 0x154   : > { %v344_v10 = vadd.f32 %v343_v9, %v262_v6 }
 0x155   : > { %346 = vst [vmem:[%s253_s30] sm:$0xff] %v342_v8 }
 0x156   : > { %347 = vst [vmem:[%s253_s30 + $0x8] sm:$0xff] %v344_v10 }
 0x157   : > { %689 = shalt.err (!%p686_p4)
}
 0x158   : > { %s690_s11 = scalar_lea.hbm %s994_s9, 256  ;;  %s694_s6 = scalar_lea.hbm %s1046_s3, 512 }
 0x159   : > { %p691_p8 = scmp.ne.s32.totalorder %s994_s9, %s690_s11  ;;  %p695_p3 = scmp.lt.u32.totalorder %s994_s9, %s1046_s3 }
 0x15a   : > { %p696_p13 = scmp.lt.u32.totalorder %s694_s6, %s690_s11  ;;  %p698_p12 = scmp.lt.u32.totalorder %s690_s11, %s994_s9 }
 0x15b   : > { %p692_p9 = pnand %p691_p8, %p1068_p0 }
 0x15c   : > { %p697_p11 = por %p696_p13, %p695_p3 }
 0x15d   : > { %p693_p6 = pneg %p692_p9 }
 0x15e   : > { %p699_p5 = por %p698_p12, %p697_p11 }
 0x160   : > { %p700_p10 = pnand %p699_p5, %p693_p6 }
 0x162   : > { %703 = shalt.err (!%p700_p10)
}
 0x163   : > { %514 = dma.vmem_to_hbm [thread:$0]  (%p1068_p0), %s996_s4, 256, %s994_s9, %s349_s26  }
 0x164 PF: > { %s377_s10 = sand.u32 1, %s746_s12   ;;  %p1069_p1 = scmp.ne.s32.totalorder %s1054_s21, 0 }
 0x165   : > { %p1070_p2 = scmp.ge.s32.totalorder %s766_s17, 2  ;;  %s378_s22 = scalar_lea.sflag [#allocation4], %s377_s10 }
 0x167   : > { %p528_p7 = pnand %p1070_p2, %p1069_p1 }
 0x169   : > { %741 = dma.done.wait (!%p528_p7), %s378_s22, 256  }
 0x16a   : > { %743 = vsyncadd (!%p528_p7), %s378_s22, 4294967040  ;;  %s22_s17 = sadd.s32 1, %s766_s17   ;;  %s1071_s23 = sld [smem:[#allocation13_spill]] }
 0x16b   : > { %p19_p4 = scmp.ge.s32.totalorder %s22_s17, 4   ;;  %s1072_s12 = smov %s750_s13 }
 0x16c   : > { %s1073_s13 = smov %s754_s14  ;;  %s1074_s14 = smov %s899_s29 }
 0x16d   : > { %s1075_s15 = smov %s762_s16  ;;  %21 = sbr.rel (!%p19_p4) target bundleno = 10 (0xa), region = 94 }
 0x170   : > { %s1076_s16 = smov %s1071_s23 }
 0x174   :  { %383 = vsyncpa [#allocation3], 1 }
 0x175   :  { %385 = vsyncpa [#allocation3 + $0x1], 1 }
 0x176   :  { %386 = vsyncpa [#allocation6], 1 }
 0x177   :  { %388 = vsyncpa [#allocation6 + $0x1], 1 }
 0x178   :  { %389 = vsyncpa [#allocation4], 1 }
 0x179   :  { %391 = vsyncpa [#allocation4 + $0x1], 1 }

</bundles_post_ra>
